<compile_context>
chip_gen: v7x
topology: tpu7x:2x2x1
jax: 0.10.0
libtpu: 0.0.40
codegen_flags: <defaults>
</compile_context>

<pallas_src>
import functools

import jax
import jax.numpy as jnp
from jax.experimental import pallas as pl
from jax.experimental.pallas import tpu as pltpu

NC = 1
IN_FEATURES = NC * 5 * 5      # 25
HIDDEN = 64
EPS = 1e-5                    # BatchNorm1d default
NEG_SLOPE = 0.2               # LeakyReLU slope
MAX_TILE = 2048               # batch-tile rows (multiple of 128 -> lane-dense stores)
_CACHE_BUDGET_BYTES = 24 << 20   # h-cache VMEM cap (lane-padded estimate)


def _round_up(n, m):
    return ((n + m - 1) // m) * m


def discriminator_kernel(x_ref, w1_ref, packed_ref, b2_ref, out_ref,
                         sum_ref, sq_ref, hcache_ref,
                         *, n_rows, tile_rows, use_cache):
    """Two-phase forward.

    grid = (2, num_tiles): phase axis first (slow), batch-tile axis second.
      phase 0: hc = x @ W1 (stored in the VMEM h-cache), accumulate per-feature
               sum / sum-of-squares of hc.  Padded rows are exactly zero, so no
               masking is required.
      phase 1: fold stats + BN affine + b1 into scale/shift (once), normalize,
               LeakyReLU, 64->1 head on VPU/XLU, sigmoid, lane-dense (1,T) store.
    """
    phase = pl.program_id(0)
    tile = pl.program_id(1)

    params = packed_ref[...]                          # (4, 64): b1, gamma, beta, w2_row
    b1 = params[0:1, :]
    gamma = params[1:2, :]
    beta = params[2:3, :]
    w2_row = params[3:4, :]

    # ---- phase 0: batch statistics on hc = x @ W1 (b1 folded out) ----
    @pl.when(phase == 0)
    def _stats():
        @pl.when(tile == 0)
        def _init():
            sum_ref[...] = jnp.zeros_like(sum_ref)
            sq_ref[...] = jnp.zeros_like(sq_ref)

        hc = jnp.dot(x_ref[...], w1_ref[...],
                     preferred_element_type=jnp.float32)          # (T, 64)
        sum_ref[...] += jnp.sum(hc, axis=0, keepdims=True)
        sq_ref[...] += jnp.sum(hc * hc, axis=0, keepdims=True)
        if use_cache:
            start = pl.multiple_of(tile * tile_rows, tile_rows)
            hcache_ref[pl.ds(start, tile_rows), :] = hc
        # Resident-block placeholder write: with out index_map (0, i*p) this
        # never reaches HBM and phase 1 fully overwrites the block.
        out_ref[...] = jnp.zeros_like(out_ref)

    # ---- phase 1: fold BN into scale/shift once, then normalize + head ----
    @pl.when(phase == 1)
    def _forward():
        @pl.when(tile == 0)
        def _fold():
            inv_n = 1.0 / float(n_rows)
            mean_c = sum_ref[...] * inv_n                             # mean of x@W1
            var = jnp.maximum(sq_ref[...] * inv_n - mean_c * mean_c, 0.0)
            scale = gamma * jax.lax.rsqrt(var + EPS)
            # hn = (hc + b1 - (mean_c + b1)) * scale + beta = hc*scale + shift
            shift = beta - mean_c * scale
            sum_ref[...] = scale        # scratch now holds per-feature scale
            sq_ref[...] = shift         # scratch now holds per-feature shift

        if use_cache:
            start = pl.multiple_of(tile * tile_rows, tile_rows)
            hc = hcache_ref[pl.ds(start, tile_rows), :]
        else:
            # Fallback path (cache too big for VMEM): recompute x @ W1.
            hc = jnp.dot(x_ref[...], w1_ref[...],
                         preferred_element_type=jnp.float32)

        hn = hc * sum_ref[...] + sq_ref[...]              # BN (+ b1) as scale/shift
        a = jnp.where(hn >= 0.0, hn, NEG_SLOPE * hn)      # LeakyReLU(0.2)
        # Linear(64 -> 1): VPU multiply + XLU row-sum instead of a 1-column matmul.
        logit = jnp.sum(a * w2_row, axis=-1) + b2_ref[0, 0]   # (T,)
        out_ref[...] = jax.nn.sigmoid(logit)[None, :]          # lane-dense (1, T)


def init_params(key):
    """Deterministic parameter init (PyTorch-style uniform bounds)."""
    k1, k2, k3, k4 = jax.random.split(key, 4)
    bound1 = 1.0 / jnp.sqrt(IN_FEATURES)
    bound2 = 1.0 / jnp.sqrt(HIDDEN)
    w1 = jax.random.uniform(k1, (IN_FEATURES, HIDDEN), jnp.float32, -bound1, bound1)
    b1 = jax.random.uniform(k2, (HIDDEN,), jnp.float32, -bound1, bound1)
    gamma = jnp.ones((HIDDEN,), jnp.float32)     # BatchNorm weight init
    beta = jnp.zeros((HIDDEN,), jnp.float32)     # BatchNorm bias init
    w2 = jax.random.uniform(k3, (HIDDEN, 1), jnp.float32, -bound2, bound2)
    b2 = jax.random.uniform(k4, (1, 1), jnp.float32, -bound2, bound2)
    return (w1, b1, gamma, beta, w2, b2)


def discriminator_forward(x_nchw, params):
    w1, b1, gamma, beta, w2, b2 = params
    n = x_nchw.shape[0]
    x = x_nchw.reshape(n, -1).astype(jnp.float32)            # nn.Flatten -> (N, 25)

    # Batch tiling: 128-aligned tiles (lane-dense output stores, clean MXU rows).
    tile = _round_up(n, 128) if n <= MAX_TILE else MAX_TILE
    n_pad = _round_up(n, tile)
    num_tiles = n_pad // tile
    if n_pad != n:
        x = jnp.pad(x, ((0, n_pad - n), (0, 0)))

    # h-cache sizing (lane-padded 64 -> 128); fall back to recompute if too big.
    hcache_padded_bytes = n_pad * 128 * 4
    use_cache = hcache_padded_bytes <= _CACHE_BUDGET_BYTES
    hcache_shape = (n_pad, HIDDEN) if use_cache else (8, HIDDEN)

    # Pack the small per-feature vectors into a single (4, 64) operand.
    packed = jnp.concatenate([b1.reshape(1, HIDDEN),
                              gamma.reshape(1, HIDDEN),
                              beta.reshape(1, HIDDEN),
                              w2.reshape(1, HIDDEN)], axis=0)
    b2_s = b2.reshape(1, 1)

    # x is only needed in phase 0 when caching: freeze its block index during
    # phase 1 at the last block so no extra DMAs are issued.
    if use_cache:
        x_index_map = lambda p, i: (i * (1 - p) + (num_tiles - 1) * p, 0)
    else:
        x_index_map = lambda p, i: (i, 0)

    # Rough VMEM budget (double-buffered inputs/outputs + cache), with headroom,
    # kept well under v7x's 64 MiB physical VMEM.
    vmem_needed = (2 * tile * 128 * 4            # x tiles (25 lanes pad to 128)
                   + 2 * 32 * 128 * 4            # w1 (25,64) padded
                   + 2 * 8 * 128 * 4             # packed (4,64) padded
                   + 2 * 8 * tile * 4            # out (1,tile) padded
                   + (hcache_padded_bytes if use_cache else 8 * 128 * 4)
                   + 4 * 8 * 128 * 4)            # sum/sq scratch
    vmem_limit = min(48 << 20, max(16 << 20, vmem_needed + (4 << 20)))

    kernel = functools.partial(discriminator_kernel,
                               n_rows=n, tile_rows=tile, use_cache=use_cache)

    out = pl.pallas_call(
        kernel,
        out_shape=jax.ShapeDtypeStruct((1, n_pad), jnp.float32),
        grid_spec=pltpu.PrefetchScalarGridSpec(
            num_scalar_prefetch=0,
            grid=(2, num_tiles),
            in_specs=[
                pl.BlockSpec((tile, IN_FEATURES), x_index_map),
                pl.BlockSpec((IN_FEATURES, HIDDEN), lambda p, i: (0, 0)),
                pl.BlockSpec((4, HIDDEN), lambda p, i: (0, 0)),
                pl.BlockSpec(memory_space=pltpu.MemorySpace.SMEM),   # b2 scalar
            ],
            # Phase 0 maps every step to output block 0 (stays resident, no
            # writeback); phase 1 visits blocks 0..num_tiles-1, each written
            # back to HBM exactly once.
            out_specs=pl.BlockSpec((1, tile), lambda p, i: (0, i * p)),
            scratch_shapes=[pltpu.VMEM((1, HIDDEN), jnp.float32),    # sum -> scale
                            pltpu.VMEM((1, HIDDEN), jnp.float32),    # sumsq -> shift
                            pltpu.VMEM(hcache_shape, jnp.float32)],  # h-cache
        ),
        # Both axes stay sequential: BN statistics and the h-cache live in
        # scratch shared by every batch tile and both phases.
        # TODO(synk): on v7x, a two-call split (stats kernel + apply kernel with
        # the batch axis "parallel") could use both TensorCores.
        compiler_params=pltpu.CompilerParams(
            dimension_semantics=("arbitrary", "arbitrary"),
            vmem_limit_bytes=vmem_limit),
    )(x, w1, packed, b2_s)

    # output.view(-1, 1).squeeze(1) -> (N,)
    return out[0, :n]


def _reference(x_nchw, params):
    """Pure-JAX reference with PyTorch training-mode BatchNorm1d semantics."""
    w1, b1, gamma, beta, w2, b2 = params
    x = x_nchw.reshape(x_nchw.shape[0], -1).astype(jnp.float32)
    h = x @ w1 + b1.reshape(1, -1)
    mean = jnp.mean(h, axis=0, keepdims=True)
    var = jnp.mean((h - mean) ** 2, axis=0, keepdims=True)
    hn = (h - mean) / jnp.sqrt(var + EPS) * gamma.reshape(1, -1) + beta.reshape(1, -1)
    a = jnp.where(hn >= 0, hn, NEG_SLOPE * hn)
    y = jax.nn.sigmoid(a @ w2.reshape(-1, 1) + b2.reshape(1, 1))
    return y.reshape(-1)


if __name__ == "__main__":
    key = jax.random.PRNGKey(0)
    kx, kp = jax.random.split(key)

    batch = 8
    x = jax.random.normal(kx, (batch, NC, 5, 5), dtype=jnp.float32)
    params = init_params(kp)

    fwd = jax.jit(discriminator_forward)
    y = fwd(x, params)
    jax.block_until_ready(y)

    y_ref = _reference(x, params)
    jax.block_until_ready(y_ref)

    assert y.shape == (batch,), y.shape
    assert bool(jnp.all(jnp.isfinite(y)))
    assert bool(jnp.all((y >= 0.0) & (y <= 1.0)))
    assert bool(jnp.allclose(y, y_ref, rtol=1e-5, atol=1e-5)), (y, y_ref)
    print("KERNEL_OK")
</pallas_src>

<mosaic_0001>
module attributes {stable_mosaic.version = 11 : i64} {
  func.func @discriminator_kernel(%arg0: i32, %arg1: i32, %arg2: memref<128x25xf32, #tpu.memory_space<vmem>>, %arg3: memref<25x64xf32, #tpu.memory_space<vmem>>, %arg4: memref<4x64xf32, #tpu.memory_space<vmem>>, %arg5: memref<1x1xf32, #tpu.memory_space<smem>>, %arg6: memref<1x128xf32, #tpu.memory_space<vmem>>, %arg7: memref<1x64xf32, #tpu.memory_space<vmem>>, %arg8: memref<1x64xf32, #tpu.memory_space<vmem>>, %arg9: memref<128x64xf32, #tpu.memory_space<vmem>>) attributes {dimension_semantics = [#tpu.dimension_semantics<arbitrary>, #tpu.dimension_semantics<arbitrary>], iteration_bounds = array<i64: 2, 1>, scalar_prefetch = 0 : i64, scratch_operands = 3 : i64, tpu.core_type = #tpu.core_type<tc>, window_params = [{transform_indices = @transform_0, window_bounds = array<i64: 128, 25>}, {pipeline_mode = #tpu.pipeline_mode<synchronous>, transform_indices = @transform_1, window_bounds = array<i64: 25, 64>}, {pipeline_mode = #tpu.pipeline_mode<synchronous>, transform_indices = @transform_2, window_bounds = array<i64: 4, 64>}, {transform_indices = @transform_3, window_bounds = array<i64: 1, 1>}, {transform_indices = @transform_4, window_bounds = array<i64: 1, 128>}]} {
    %c0 = arith.constant 0 : index
    %c0_0 = arith.constant 0 : index
    %0 = vector.load %arg4[%c0, %c0_0] : memref<4x64xf32, #tpu.memory_space<vmem>>, vector<4x64xf32>
    %1 = vector.extract_strided_slice %0 {offsets = [1, 0], sizes = [1, 64], strides = [1, 1]} : vector<4x64xf32> to vector<1x64xf32>
    %2 = vector.extract_strided_slice %0 {offsets = [2, 0], sizes = [1, 64], strides = [1, 1]} : vector<4x64xf32> to vector<1x64xf32>
    %3 = vector.extract_strided_slice %0 {offsets = [3, 0], sizes = [1, 64], strides = [1, 1]} : vector<4x64xf32> to vector<1x64xf32>
    %c0_i32 = arith.constant 0 : i32
    %4 = arith.cmpi eq, %arg0, %c0_i32 : i32
    %5 = arith.extui %4 : i1 to i32
    %c0_i32_1 = arith.constant 0 : i32
    %6 = arith.cmpi ne, %5, %c0_i32_1 : i32
    scf.if %6 {
      %c0_i32_3 = arith.constant 0 : i32
      %10 = arith.cmpi eq, %arg1, %c0_i32_3 : i32
      %11 = arith.extui %10 : i1 to i32
      %c0_i32_4 = arith.constant 0 : i32
      %12 = arith.cmpi ne, %11, %c0_i32_4 : i32
      scf.if %12 {
        %cst_23 = arith.constant 0.000000e+00 : f32
        %33 = vector.broadcast %cst_23 : f32 to vector<1x64xf32>
        %c0_24 = arith.constant 0 : index
        %c0_25 = arith.constant 0 : index
        %34 = vector.load %arg7[%c0_24, %c0_25] : memref<1x64xf32, #tpu.memory_space<vmem>>, vector<1x64xf32>
        tpu.vector_store %arg7[%c0_24, %c0_25], %33 {strides = array<i32>} : memref<1x64xf32, #tpu.memory_space<vmem>>, vector<1x64xf32>,
        %cst_26 = arith.constant 0.000000e+00 : f32
        %35 = vector.broadcast %cst_26 : f32 to vector<1x64xf32>
        %c0_27 = arith.constant 0 : index
        %c0_28 = arith.constant 0 : index
        %36 = vector.load %arg8[%c0_27, %c0_28] : memref<1x64xf32, #tpu.memory_space<vmem>>, vector<1x64xf32>
        tpu.vector_store %arg8[%c0_27, %c0_28], %35 {strides = array<i32>} : memref<1x64xf32, #tpu.memory_space<vmem>>, vector<1x64xf32>,
      } else {
      }
      %c0_5 = arith.constant 0 : index
      %c0_6 = arith.constant 0 : index
      %13 = vector.load %arg2[%c0_5, %c0_6] : memref<128x25xf32, #tpu.memory_space<vmem>>, vector<128x25xf32>
      %c0_7 = arith.constant 0 : index
      %c0_8 = arith.constant 0 : index
      %14 = vector.load %arg3[%c0_7, %c0_8] : memref<25x64xf32, #tpu.memory_space<vmem>>, vector<25x64xf32>
      %cst = arith.constant dense<0.000000e+00> : vector<128x64xf32>
      %15 = tpu.matmul %13, %14, %cst {dimension_numbers = #tpu.dot_dimension_numbers<[1], [0], [0], [1], [0, 0, 1, 1], [], []>} : vector<128x25xf32>, vector<25x64xf32>, vector<128x64xf32> -> vector<128x64xf32>
      %c0_9 = arith.constant 0 : index
      %c0_10 = arith.constant 0 : index
      %16 = vector.load %arg7[%c0_9, %c0_10] : memref<1x64xf32, #tpu.memory_space<vmem>>, vector<1x64xf32>
      %cst_11 = arith.constant dense<0.000000e+00> : vector<64xf32>
      %17 = vector.multi_reduction <add>, %15, %cst_11 [0] : vector<128x64xf32> to vector<64xf32>
      %18 = vector.shape_cast %17 : vector<64xf32> to vector<1x64xf32>
      %19 = arith.addf %16, %18 : vector<1x64xf32>
      %c0_12 = arith.constant 0 : index
      %c0_13 = arith.constant 0 : index
      %20 = vector.load %arg7[%c0_12, %c0_13] : memref<1x64xf32, #tpu.memory_space<vmem>>, vector<1x64xf32>
      tpu.vector_store %arg7[%c0_12, %c0_13], %19 {strides = array<i32>} : memref<1x64xf32, #tpu.memory_space<vmem>>, vector<1x64xf32>,
      %c0_14 = arith.constant 0 : index
      %c0_15 = arith.constant 0 : index
      %21 = vector.load %arg8[%c0_14, %c0_15] : memref<1x64xf32, #tpu.memory_space<vmem>>, vector<1x64xf32>
      %22 = arith.mulf %15, %15 : vector<128x64xf32>
      %cst_16 = arith.constant dense<0.000000e+00> : vector<64xf32>
      %23 = vector.multi_reduction <add>, %22, %cst_16 [0] : vector<128x64xf32> to vector<64xf32>
      %24 = vector.shape_cast %23 : vector<64xf32> to vector<1x64xf32>
      %25 = arith.addf %21, %24 : vector<1x64xf32>
      %c0_17 = arith.constant 0 : index
      %c0_18 = arith.constant 0 : index
      %26 = vector.load %arg8[%c0_17, %c0_18] : memref<1x64xf32, #tpu.memory_space<vmem>>, vector<1x64xf32>
      tpu.vector_store %arg8[%c0_17, %c0_18], %25 {strides = array<i32>} : memref<1x64xf32, #tpu.memory_space<vmem>>, vector<1x64xf32>,
      %c128_i32 = arith.constant 128 : i32
      %27 = arith.muli %arg1, %c128_i32 : i32
      %28 = tpu.assume_multiple %27, 128 : i32
      %29 = arith.index_cast %28 : i32 to index
      %c0_19 = arith.constant 0 : index
      %30 = vector.load %arg9[%29, %c0_19] : memref<128x64xf32, #tpu.memory_space<vmem>>, vector<128x64xf32>
      tpu.vector_store %arg9[%29, %c0_19], %15 {strides = array<i32>} : memref<128x64xf32, #tpu.memory_space<vmem>>, vector<128x64xf32>,
      %cst_20 = arith.constant 0.000000e+00 : f32
      %31 = vector.broadcast %cst_20 : f32 to vector<1x128xf32>
      %c0_21 = arith.constant 0 : index
      %c0_22 = arith.constant 0 : index
      %32 = vector.load %arg6[%c0_21, %c0_22] : memref<1x128xf32, #tpu.memory_space<vmem>>, vector<1x128xf32>
      tpu.vector_store %arg6[%c0_21, %c0_22], %31 {strides = array<i32>} : memref<1x128xf32, #tpu.memory_space<vmem>>, vector<1x128xf32>,
    } else {
    }
    %c1_i32 = arith.constant 1 : i32
    %7 = arith.cmpi eq, %arg0, %c1_i32 : i32
    %8 = arith.extui %7 : i1 to i32
    %c0_i32_2 = arith.constant 0 : i32
    %9 = arith.cmpi ne, %8, %c0_i32_2 : i32
    scf.if %9 {
      %c0_i32_3 = arith.constant 0 : i32
      %10 = arith.cmpi eq, %arg1, %c0_i32_3 : i32
      %11 = arith.extui %10 : i1 to i32
      %c0_i32_4 = arith.constant 0 : i32
      %12 = arith.cmpi ne, %11, %c0_i32_4 : i32
      scf.if %12 {
        %c0_17 = arith.constant 0 : index
        %c0_18 = arith.constant 0 : index
        %41 = vector.load %arg7[%c0_17, %c0_18] : memref<1x64xf32, #tpu.memory_space<vmem>>, vector<1x64xf32>
        %cst_19 = arith.constant 1.250000e-01 : f32
        %42 = vector.broadcast %cst_19 : f32 to vector<1x64xf32>
        %43 = arith.mulf %41, %42 : vector<1x64xf32>
        %c0_20 = arith.constant 0 : index
        %c0_21 = arith.constant 0 : index
        %44 = vector.load %arg8[%c0_20, %c0_21] : memref<1x64xf32, #tpu.memory_space<vmem>>, vector<1x64xf32>
        %cst_22 = arith.constant 1.250000e-01 : f32
        %45 = vector.broadcast %cst_22 : f32 to vector<1x64xf32>
        %46 = arith.mulf %44, %45 : vector<1x64xf32>
        %47 = arith.mulf %43, %43 : vector<1x64xf32>
        %48 = arith.subf %46, %47 : vector<1x64xf32>
        %cst_23 = arith.constant 0.000000e+00 : f32
        %49 = vector.broadcast %cst_23 : f32 to vector<1x64xf32>
        %50 = arith.maximumf %48, %49 : vector<1x64xf32>
        %cst_24 = arith.constant 9.99999974E-6 : f32
        %51 = vector.broadcast %cst_24 : f32 to vector<1x64xf32>
        %52 = arith.addf %50, %51 : vector<1x64xf32>
        %53 = math.rsqrt %52 : vector<1x64xf32>
        %54 = arith.mulf %1, %53 : vector<1x64xf32>
        %55 = arith.mulf %43, %54 : vector<1x64xf32>
        %56 = arith.subf %2, %55 : vector<1x64xf32>
        %c0_25 = arith.constant 0 : index
        %c0_26 = arith.constant 0 : index
        %57 = vector.load %arg7[%c0_25, %c0_26] : memref<1x64xf32, #tpu.memory_space<vmem>>, vector<1x64xf32>
        tpu.vector_store %arg7[%c0_25, %c0_26], %54 {strides = array<i32>} : memref<1x64xf32, #tpu.memory_space<vmem>>, vector<1x64xf32>,
        %c0_27 = arith.constant 0 : index
        %c0_28 = arith.constant 0 : index
        %58 = vector.load %arg8[%c0_27, %c0_28] : memref<1x64xf32, #tpu.memory_space<vmem>>, vector<1x64xf32>
        tpu.vector_store %arg8[%c0_27, %c0_28], %56 {strides = array<i32>} : memref<1x64xf32, #tpu.memory_space<vmem>>, vector<1x64xf32>,
      } else {
      }
      %c128_i32 = arith.constant 128 : i32
      %13 = arith.muli %arg1, %c128_i32 : i32
      %14 = tpu.assume_multiple %13, 128 : i32
      %15 = arith.index_cast %14 : i32 to index
      %c0_5 = arith.constant 0 : index
      %16 = vector.load %arg9[%15, %c0_5] : memref<128x64xf32, #tpu.memory_space<vmem>>, vector<128x64xf32>
      %c0_6 = arith.constant 0 : index
      %c0_7 = arith.constant 0 : index
      %17 = vector.load %arg7[%c0_6, %c0_7] : memref<1x64xf32, #tpu.memory_space<vmem>>, vector<1x64xf32>
      %18 = vector.broadcast %17 : vector<1x64xf32> to vector<128x64xf32>
      %19 = arith.mulf %16, %18 : vector<128x64xf32>
      %c0_8 = arith.constant 0 : index
      %c0_9 = arith.constant 0 : index
      %20 = vector.load %arg8[%c0_8, %c0_9] : memref<1x64xf32, #tpu.memory_space<vmem>>, vector<1x64xf32>
      %21 = vector.broadcast %20 : vector<1x64xf32> to vector<128x64xf32>
      %22 = arith.addf %19, %21 : vector<128x64xf32>
      %cst = arith.constant 0.000000e+00 : f32
      %23 = vector.broadcast %cst : f32 to vector<128x64xf32>
      %24 = arith.cmpf oge, %22, %23 : vector<128x64xf32>
      %cst_10 = arith.constant 2.000000e-01 : f32
      %25 = vector.broadcast %cst_10 : f32 to vector<128x64xf32>
      %26 = arith.mulf %25, %22 : vector<128x64xf32>
      %27 = arith.select %24, %22, %26 : vector<128x64xi1>, vector<128x64xf32>
      %28 = vector.broadcast %3 : vector<1x64xf32> to vector<128x64xf32>
      %29 = arith.mulf %27, %28 : vector<128x64xf32>
      %cst_11 = arith.constant dense<0.000000e+00> : vector<128xf32>
      %30 = vector.multi_reduction <add>, %29, %cst_11 [1] : vector<128x64xf32> to vector<128xf32>
      %c0_12 = arith.constant 0 : index
      %c0_13 = arith.constant 0 : index
      %31 = memref.load %arg5[%c0_12, %c0_13] : memref<1x1xf32, #tpu.memory_space<smem>>
      %32 = vector.broadcast %31 : f32 to vector<128xf32>
      %33 = arith.addf %30, %32 : vector<128xf32>
      %34 = arith.negf %33 : vector<128xf32>
      %35 = math.exp %34 : vector<128xf32>
      %cst_14 = arith.constant 1.000000e+00 : f32
      %36 = vector.broadcast %cst_14 : f32 to vector<128xf32>
      %37 = arith.addf %36, %35 : vector<128xf32>
      %38 = arith.divf %36, %37 : vector<128xf32>
      %39 = vector.shape_cast %38 : vector<128xf32> to vector<1x128xf32>
      %c0_15 = arith.constant 0 : index
      %c0_16 = arith.constant 0 : index
      %40 = vector.load %arg6[%c0_15, %c0_16] : memref<1x128xf32, #tpu.memory_space<vmem>>, vector<1x128xf32>
      tpu.vector_store %arg6[%c0_15, %c0_16], %39 {strides = array<i32>} : memref<1x128xf32, #tpu.memory_space<vmem>>, vector<1x128xf32>,
    } else {
    }
    return
  }
  func.func @transform_0(%arg0: i32, %arg1: i32) -> (i32, i32) {
    %c1_i32 = arith.constant 1 : i32
    %0 = arith.subi %c1_i32, %arg0 : i32
    %1 = arith.muli %arg1, %0 : i32
    %c0_i32 = arith.constant 0 : i32
    %2 = arith.muli %c0_i32, %arg0 : i32
    %3 = arith.addi %1, %2 : i32
    %c0_i32_0 = arith.constant 0 : i32
    %c0_i32_1 = arith.constant 0 : i32
    return %3, %c0_i32_0 : i32, i32
  }
  func.func @transform_1(%arg0: i32, %arg1: i32) -> (i32, i32) {
    %c0_i32 = arith.constant 0 : i32
    %c0_i32_0 = arith.constant 0 : i32
    %c0_i32_1 = arith.constant 0 : i32
    return %c0_i32, %c0_i32_0 : i32, i32
  }
  func.func @transform_2(%arg0: i32, %arg1: i32) -> (i32, i32) {
    %c0_i32 = arith.constant 0 : i32
    %c0_i32_0 = arith.constant 0 : i32
    %c0_i32_1 = arith.constant 0 : i32
    return %c0_i32, %c0_i32_0 : i32, i32
  }
  func.func @transform_3(%arg0: i32, %arg1: i32) -> (i32, i32) {
    %c0_i32 = arith.constant 0 : i32
    %c0_i32_0 = arith.constant 0 : i32
    %c0_i32_1 = arith.constant 0 : i32
    return %c0_i32, %c0_i32_0 : i32, i32
  }
  func.func @transform_4(%arg0: i32, %arg1: i32) -> (i32, i32) {
    %0 = arith.muli %arg1, %arg0 : i32
    %c0_i32 = arith.constant 0 : i32
    %c0_i32_0 = arith.constant 0 : i32
    return %c0_i32, %0 : i32, i32
  }
}

</mosaic_0001>

<bundles_post_ra>
// kernel: discriminator_forward.1
= control target key start
LH: loop header
LB: loop body
LE: loop exit
PB: predicated region body
PF: predicated region fallthrough
CT: control target
= control target key end

     0   :  { %s1376_s17 = smov 0   ;;  %s1378_s18 = smov 0   ;;  %s1705_s0 = inlined_call_operand.vmem [shape: f32[128,25], index: 0, kind: input, shape index: {}]   ;;  %s1706_s1 = inlined_call_operand.vmem [shape: f32[25,64], index: 1, kind: input, shape index: {}]   ;;  %s1707_s2 = inlined_call_operand.vmem [shape: f32[4,64], index: 2, kind: input, shape index: {}]   ;;  %s1708_s3 = inlined_call_operand.<no memory space> [shape: f32[1,1], index: 3, kind: input, shape index: {}]   ;;  %s1709_s4 = inlined_call_operand.vmem [shape: f32[1,128], index: 4, kind: output, shape index: {}]  }
   0x1   :  { %9 = sst [smem:[#allocation5]] %s1708_s3  ;;  %s1380_s19 = smov 0  }
   0x2 LB: > { %s27_s3 = sadd.s32 1, %s1339_s18  ;;  %p1120_p0 = scmp.ge.s32.totalorder %s1343_s19, 1  ;;  %s1343_s19 = sphi %s1380_s19, %s15_s19   ;;  %s1339_s18 = sphi %s1378_s18, %s1711_s18   ;;  %s1335_s17 = sphi %s1376_s17, %s1710_s17  }
   0x3   : > { %p29_p1 = scmp.ge.s32.totalorder %s27_s3, 2  ;;  %p186_p2 = scmp.lt.s32.totalorder %s1343_s19, 3 }
   0x5   : > { %s1713_s3 = smov (%p29_p1, %s27_s3), 0  ;;  %p187_p3 = pnand %p1120_p0, %p186_p2 }
   0x6   : > { %v1399_v0 = vld [vmem:[%s1707_s2] sm:$0xf] (!%p187_p3)  ;;  %p1121_p4 = scmp.ne.s32.totalorder (!%p187_p3), %s1335_s17, 0 }
   0x7   : > { %190 = sbr.rel (%p187_p3) target bundleno = 551 (0x227), region = 36 }
   0xe   : > { %232 = sbr.rel (%p1121_p4) target bundleno = 288 (0x120), region = 40  ;;  %v256_v1 = vld [vmem:[%s1706_s1] sm:$0xff] (!%p1121_p4)  ;;  %v257_v2 = vld [vmem:[%s1706_s1 + $0x8] sm:$0xff] (!%p1121_p4)  ;;  %v258_v3 = vld [vmem:[%s1706_s1 + $0x10] sm:$0xff] (!%p1121_p4)  ;;  %vm309_vm0 = vcmask (!%p1121_p4), 1040384   ;;  %vm260_vm1 = vcmask (!%p1121_p4), 203776  }
   0xf   : > { %v1214_v4 = vpack.c.bf16 (!%p1121_p4), %v257_v2, %v256_v1  ;;  %v259_v5 = vld [vmem:[%s1706_s1 + $0x18] sm:$0x1] (!%p1121_p4)  ;;  %v240_v6 = vld [vmem:[%s1705_s0] sm:$0xff] (!%p1121_p4)  ;;  %vm1345_vm2 = vmmov (!%p1121_p4), 1   ;;  %v241_v9 = vld [vmem:[%s1705_s0 + $0x8] sm:$0xff] (!%p1121_p4)  ;;  %vm237_vm4 = vcmask (!%p1121_p4), 516096  }
  0x10   : > { %v1218_v7 = vpack.c.bf16 (!%p1121_p4), %v259_v5, %v258_v3  ;;  %vm1219_vm3 = vmpackc.low (!%p1121_p4), %vm309_vm0, %vm1345_vm2  ;;  %1190 = vmatprep.mubr.msk.f32.mxu0 (!%p1121_p4), %vm260_vm1, %v240_v6  ;;  %v248_v8 = vld [vmem:[%s1705_s0 + $0x40] sm:$0xff] (!%p1121_p4)  ;;  %v249_v10 = vld [vmem:[%s1705_s0 + $0x48] sm:$0xff] (!%p1121_p4)  ;;  %v1346_v23 = vmov (!%p1121_p4), 0.0   ;;  %vm459_vm5 = vcmask (!%p1121_p4), 523264  }
  0x11   : > { %1215 = vmatprep.subr.bf16.mxu0 (!%p1121_p4), %v1214_v4  ;;  %1224 = vmatprep.subr.bf16.mxu1 (!%p1121_p4), %v1214_v4  ;;  %v242_v11 = vld [vmem:[%s1705_s0 + $0x10] sm:$0xff] (!%p1121_p4)  ;;  %v243_v13 = vld [vmem:[%s1705_s0 + $0x18] sm:$0xff] (!%p1121_p4)  ;;  %v244_v15 = vld [vmem:[%s1705_s0 + $0x20] sm:$0xff] (!%p1121_p4)  ;;  %238 = vst.msk [vmem:[#allocation2] sm:$0x1] (!%p1121_p4), %vm237_vm4, %v1346_v23 }
  0x12   : > { %1217 = vmatpush3.bf16.msra.mxu0 (!%p1121_p4), %v1214_v4  ;;  %1226 = vmatpush3.bf16.msra.mxu1 (!%p1121_p4), %v1214_v4  ;;  %v250_v12 = vld [vmem:[%s1705_s0 + $0x50] sm:$0xff] (!%p1121_p4)  ;;  %v251_v14 = vld [vmem:[%s1705_s0 + $0x58] sm:$0xff] (!%p1121_p4)  ;;  %v252_v16 = vld [vmem:[%s1705_s0 + $0x60] sm:$0xff] (!%p1121_p4)  ;;  %239 = vst.msk [vmem:[#allocation3] sm:$0x1] (!%p1121_p4), %vm237_vm4, %v1346_v23 }
  0x13   : > { %1220 = vmatprep.subr.msk.bf16.mxu0 (!%p1121_p4), %vm1219_vm3, %v1218_v7  ;;  %1225 = vmatprep.subr.msk.bf16.mxu1 (!%p1121_p4), %vm1219_vm3, %v1218_v7  ;;  %v245_v17 = vld [vmem:[%s1705_s0 + $0x28] sm:$0xff] (!%p1121_p4)  ;;  %v246_v19 = vld [vmem:[%s1705_s0 + $0x30] sm:$0xff] (!%p1121_p4)  ;;  %v247_v21 = vld [vmem:[%s1705_s0 + $0x38] sm:$0xff] (!%p1121_p4)  ;;  %574 = vst [vmem:[%s1709_s4] sm:$0x1] (!%p1121_p4), %v1346_v23 }
  0x14   : > { %1202 = vmatprep.mubr.msk.f32.mxu1 (!%p1121_p4), %vm260_vm1, %v248_v8  ;;  %v253_v18 = vld [vmem:[%s1705_s0 + $0x68] sm:$0xff] (!%p1121_p4)  ;;  %v254_v20 = vld [vmem:[%s1705_s0 + $0x70] sm:$0xff] (!%p1121_p4)  ;;  %v255_v22 = vld [vmem:[%s1705_s0 + $0x78] sm:$0xff] (!%p1121_p4) }
  0x16   : > { %1223 = vmatpush3.bf16.msk.msra.mxu0 %vm1219_vm3, %v1218_v7  ;;  %1227 = vmatpush3.bf16.msk.msra.mxu1 %vm1219_vm3, %v1218_v7 }
  0x19   : > { %1191 = vmatmul.mubr.msk.f32.vlgmr.msra.gmra.mrb[0].mxu0 %vm260_vm1, %v241_v9  ;;  %1203 = vmatmul.mubr.msk.f32.vlgmr.msra.gmra.mrb[0].mxu1 %vm260_vm1, %v249_v10 }
  0x1a   : > { %1193 = vmatprep.mubr.msk.f32.mxu0 %vm260_vm1, %v242_v11  ;;  %1205 = vmatprep.mubr.msk.f32.mxu1 %vm260_vm1, %v250_v12 }
  0x1d   : > { %1194 = vmatmul.mubr.msk.f32.gmra.mrb[2].mxu0 %vm260_vm1, %v243_v13  ;;  %1206 = vmatmul.mubr.msk.f32.gmra.mrb[2].mxu1 %vm260_vm1, %v251_v14 }
  0x1e   : > { %1196 = vmatprep.mubr.msk.f32.mxu0 %vm260_vm1, %v244_v15  ;;  %1208 = vmatprep.mubr.msk.f32.mxu1 %vm260_vm1, %v252_v16 }
  0x21   : > { %1197 = vmatmul.mubr.msk.f32.gmra.mrb[4].mxu0 %vm260_vm1, %v245_v17  ;;  %1209 = vmatmul.mubr.msk.f32.gmra.mrb[4].mxu1 %vm260_vm1, %v253_v18 }
  0x22   : > { %1199 = vmatprep.mubr.msk.f32.mxu0 %vm260_vm1, %v246_v19  ;;  %1211 = vmatprep.mubr.msk.f32.mxu1 %vm260_vm1, %v254_v20 }
  0x25   : > { %1200 = vmatmul.mubr.msk.f32.gmra.mrb[6].mxu0 %vm260_vm1, %v247_v21  ;;  %1212 = vmatmul.mubr.msk.f32.gmra.mrb[6].mxu1 %vm260_vm1, %v255_v22 }
  0xec   : > { %v1192_v24 = vpop.f32.mrb[0].mxu0  ;;  %v1483_v25 = vpop.f32.mrb[0].mxu1 }
  0xed   : > { %v461_v26 = vsel %vm459_vm5, %v1192_v24, 0.0  ;;  %v502_v27 = vmul.f32 %v1192_v24, %v1192_v24  ;;  %559 = vst.msk [vmem:[#allocation4 + $0x8] sm:$0xff] %vm459_vm5, %v1192_v24  ;;  %v379_v28 = vpop.f32.mrb[1].mxu0  ;;  %567 = vst.msk [vmem:[#allocation4 + $0x48] sm:$0xff] %vm459_vm5, %v1483_v25  ;;  %v419_v29 = vpop.f32.mrb[1].mxu1  ;;  %v510_v16 = vmul.f32 %v1483_v25, %v1483_v25  ;;  %v477_v21 = vsel %vm459_vm5, %v1483_v25, 0.0 }
  0xee   : > { %v460_v30 = vsel %vm459_vm5, %v379_v28, 0.0  ;;  %v501_v31 = vmul.f32 %v379_v28, %v379_v28  ;;  %558 = vst.msk [vmem:[#allocation4] sm:$0xff] %vm459_vm5, %v379_v28  ;;  %566 = vst.msk [vmem:[#allocation4 + $0x40] sm:$0xff] %vm459_vm5, %v419_v29  ;;  %v509_v2 = vmul.f32 %v419_v29, %v419_v29  ;;  %v475_v12 = vsel %vm459_vm5, %v419_v29, 0.0 }
  0xef   : > { %v518_v32 = vsel %vm459_vm5, %v502_v27, 0.0  ;;  %v462_v33 = vadd.f32 %v461_v26, %v460_v30  ;;  %v534_v26 = vsel %vm459_vm5, %v510_v16, 0.0 }
  0xf0   : > { %v517_v34 = vsel %vm459_vm5, %v501_v31, 0.0  ;;  %v1195_v35 = vpop.f32.mrb[2].mxu0  ;;  %v1494_v36 = vpop.f32.mrb[2].mxu1  ;;  %v532_v17 = vsel %vm459_vm5, %v509_v2, 0.0  ;;  %v458_v2 = vld [vmem:[#allocation2] sm:$0x1] }
  0xf1   : > { %v519_v37 = vadd.f32 %v518_v32, %v517_v34  ;;  %561 = vst.msk [vmem:[#allocation4 + $0x18] sm:$0xff] %vm459_vm5, %v1195_v35  ;;  %v389_v38 = vpop.f32.mrb[3].mxu0  ;;  %569 = vst.msk [vmem:[#allocation4 + $0x58] sm:$0xff] %vm459_vm5, %v1494_v36  ;;  %v429_v39 = vpop.f32.mrb[3].mxu1  ;;  %v504_v40 = vmul.f32 %v1195_v35, %v1195_v35  ;;  %v465_v44 = vsel %vm459_vm5, %v1195_v35, 0.0  ;;  %v512_v27 = vmul.f32 %v1494_v36, %v1494_v36 }
  0xf2   : > { %v463_v41 = vsel %vm459_vm5, %v389_v38, 0.0  ;;  %v503_v42 = vmul.f32 %v389_v38, %v389_v38  ;;  %560 = vst.msk [vmem:[#allocation4 + $0x10] sm:$0xff] %vm459_vm5, %v389_v38  ;;  %568 = vst.msk [vmem:[#allocation4 + $0x50] sm:$0xff] %vm459_vm5, %v429_v39  ;;  %v511_v18 = vmul.f32 %v429_v39, %v429_v39  ;;  %v479_v22 = vsel %vm459_vm5, %v429_v39, 0.0 }
  0xf3   : > { %v464_v43 = vadd.f32 %v463_v41, %v462_v33  ;;  %v522_v52 = vsel %vm459_vm5, %v504_v40, 0.0  ;;  %v481_v32 = vsel %vm459_vm5, %v1494_v36, 0.0  ;;  %v538_v35 = vsel %vm459_vm5, %v512_v27, 0.0 }
  0xf4   : > { %v520_v45 = vsel %vm459_vm5, %v503_v42, 0.0  ;;  %v1198_v46 = vpop.f32.mrb[4].mxu0  ;;  %v1504_v47 = vpop.f32.mrb[4].mxu1  ;;  %v536_v28 = vsel %vm459_vm5, %v511_v18, 0.0 }
  0xf5   : > { %v521_v48 = vadd.f32 %v520_v45, %v519_v37  ;;  %563 = vst.msk [vmem:[#allocation4 + $0x28] sm:$0xff] %vm459_vm5, %v1198_v46  ;;  %v399_v49 = vpop.f32.mrb[5].mxu0  ;;  %v466_v50 = vadd.f32 %v465_v44, %v464_v43  ;;  %571 = vst.msk [vmem:[#allocation4 + $0x68] sm:$0xff] %vm459_vm5, %v1504_v47  ;;  %v439_v51 = vpop.f32.mrb[5].mxu1  ;;  %v506_v53 = vmul.f32 %v1198_v46, %v1198_v46  ;;  %v469_v58 = vsel %vm459_vm5, %v1198_v46, 0.0 }
  0xf6   : > { %v467_v54 = vsel %vm459_vm5, %v399_v49, 0.0  ;;  %v505_v55 = vmul.f32 %v399_v49, %v399_v49  ;;  %562 = vst.msk [vmem:[#allocation4 + $0x20] sm:$0xff] %vm459_vm5, %v399_v49  ;;  %570 = vst.msk [vmem:[#allocation4 + $0x60] sm:$0xff] %vm459_vm5, %v439_v51  ;;  %v513_v29 = vmul.f32 %v439_v51, %v439_v51  ;;  %v483_v33 = vsel %vm459_vm5, %v439_v51, 0.0 }
  0xf7   : > { %v468_v56 = vadd.f32 %v467_v54, %v466_v50  ;;  %v523_v57 = vadd.f32 %v522_v52, %v521_v48  ;;  %v526_v4 = vsel %vm459_vm5, %v506_v53, 0.0  ;;  %v514_v37 = vmul.f32 %v1504_v47, %v1504_v47 }
  0xf8   : > { %v524_v59 = vsel %vm459_vm5, %v505_v55, 0.0  ;;  %v1201_v60 = vpop.f32.mrb[6].mxu0  ;;  %v1213_v61 = vpop.f32.mrb[6].mxu1  ;;  %v540_v38 = vsel %vm459_vm5, %v513_v29, 0.0  ;;  %v485_v42 = vsel %vm459_vm5, %v1504_v47, 0.0 }
  0xf9   : > { %v525_v62 = vadd.f32 %v524_v59, %v523_v57  ;;  %565 = vst.msk [vmem:[#allocation4 + $0x38] sm:$0xff] %vm459_vm5, %v1201_v60  ;;  %v409_v63 = vpop.f32.mrb[7].mxu0  ;;  %v470_v1 = vadd.f32 %v469_v58, %v468_v56  ;;  %573 = vst.msk [vmem:[#allocation4 + $0x78] sm:$0xff] %vm459_vm5, %v1213_v61  ;;  %v449_v3 = vpop.f32.mrb[7].mxu1  ;;  %v508_v5 = vmul.f32 %v1201_v60, %v1201_v60  ;;  %v473_v10 = vsel %vm459_vm5, %v1201_v60, 0.0 }
  0xfa   : > { %v471_v6 = vsel %vm459_vm5, %v409_v63, 0.0  ;;  %v507_v7 = vmul.f32 %v409_v63, %v409_v63  ;;  %564 = vst.msk [vmem:[#allocation4 + $0x30] sm:$0xff] %vm459_vm5, %v409_v63  ;;  %572 = vst.msk [vmem:[#allocation4 + $0x70] sm:$0xff] %vm459_vm5, %v449_v3  ;;  %v515_v39 = vmul.f32 %v449_v3, %v449_v3  ;;  %v487_v43 = vsel %vm459_vm5, %v449_v3, 0.0 }
  0xfb   : > { %v472_v8 = vadd.f32 %v471_v6, %v470_v1  ;;  %v527_v9 = vadd.f32 %v526_v4, %v525_v62  ;;  %v530_v15 = vsel %vm459_vm5, %v508_v5, 0.0  ;;  %v542_v45 = vsel %vm459_vm5, %v514_v37, 0.0  ;;  %v500_v5 = vld [vmem:[#allocation3] sm:$0x1] }
  0xfc   : > { %v528_v11 = vsel %vm459_vm5, %v507_v7, 0.0  ;;  %v516_v46 = vmul.f32 %v1213_v61, %v1213_v61  ;;  %v544_v48 = vsel %vm459_vm5, %v515_v39, 0.0  ;;  %v489_v51 = vsel %vm459_vm5, %v1213_v61, 0.0 }
  0xfd   : > { %v474_v13 = vadd.f32 %v473_v10, %v472_v8  ;;  %v529_v14 = vadd.f32 %v528_v11, %v527_v9 }
  0xfe   : > { %v546_v54 = vsel %vm459_vm5, %v516_v46, 0.0 }
  0xff   : > { %v531_v19 = vadd.f32 %v530_v15, %v529_v14  ;;  %v476_v20 = vadd.f32 %v475_v12, %v474_v13 }
 0x101   : > { %v533_v23 = vadd.f32 %v532_v17, %v531_v19  ;;  %v478_v24 = vadd.f32 %v477_v21, %v476_v20 }
 0x103   : > { %v480_v30 = vadd.f32 %v479_v22, %v478_v24  ;;  %v535_v31 = vadd.f32 %v534_v26, %v533_v23 }
 0x105   : > { %v537_v25 = vadd.f32 %v536_v28, %v535_v31  ;;  %v482_v34 = vadd.f32 %v481_v32, %v480_v30 }
 0x107   : > { %v484_v40 = vadd.f32 %v483_v33, %v482_v34  ;;  %v539_v41 = vadd.f32 %v538_v35, %v537_v25 }
 0x109   : > { %v541_v36 = vadd.f32 %v540_v38, %v539_v41  ;;  %v486_v44 = vadd.f32 %v485_v42, %v484_v40 }
 0x10b   : > { %v488_v49 = vadd.f32 %v487_v43, %v486_v44  ;;  %v543_v50 = vadd.f32 %v542_v45, %v541_v36 }
 0x10d   : > { %v490_v52 = vadd.f32 %v489_v51, %v488_v49  ;;  %v545_v53 = vadd.f32 %v544_v48, %v543_v50 }
 0x10f   : > { %v491_v55 = vrot.slane %v490_v52, 4  ;;  %v547_v56 = vadd.f32 %v546_v54, %v545_v53 }
 0x111   : > { %v492_v47 = vadd.f32 %v491_v55, %v490_v52  ;;  %v548_v57 = vrot.slane %v547_v56, 4 }
 0x113   : > { %v493_v58 = vrot.slane %v492_v47, 2  ;;  %v549_v59 = vadd.f32 %v548_v57, %v547_v56 }
 0x115   : > { %v494_v60 = vadd.f32 %v493_v58, %v492_v47  ;;  %v550_v62 = vrot.slane %v549_v59, 2 }
 0x117   : > { %v495_v63 = vrot.slane %v494_v60, 1  ;;  %v551_v1 = vadd.f32 %v550_v62, %v549_v59 }
 0x119   : > { %v496_v3 = vadd.f32 %v495_v63, %v494_v60  ;;  %v552_v4 = vrot.slane %v551_v1, 1 }
 0x11b   : > { %v497_v6 = vadd.f32 %v496_v3, %v458_v2  ;;  %v553_v61 = vadd.f32 %v552_v4, %v551_v1 }
 0x11d   : > { %499 = vst.msk [vmem:[#allocation2] sm:$0x1] %vm237_vm4, %v497_v6  ;;  %v554_v7 = vadd.f32 %v553_v61, %v500_v5 }
 0x11f   : > { %555 = vst.msk [vmem:[#allocation3] sm:$0x1] %vm237_vm4, %v554_v7 }
 0x120 PF: > { %p1139_p5 = scmp.ne.s32.totalorder %s1335_s17, 1 }
 0x121   : > { %v593_v16 = vlaneseq (!%p1139_p5)  ;;  %v1347_v18 = vmov (!%p1139_p5), 1966171168   ;;  %vm624_vm6 = vcmask (!%p1139_p5), 517121   ;;  %vm626_vm7 = vcmask (!%p1139_p5), 518146   ;;  %v630_v33 = vld [vmem:[#allocation4] sm:$0xff] (!%p1139_p5)  ;;  %v632_v25 = vld [vmem:[#allocation4 + $0x10] sm:$0xff] (!%p1139_p5) }
 0x122   : > { %578 = sbr.rel (%p1139_p5) target bundleno = 551 (0x227), region = 48  ;;  %v601_v19 = vunpack.c.l.s4 (!%p1139_p5), %v1347_v18  ;;  %v631_v34 = vld [vmem:[#allocation4 + $0x8] sm:$0xff] (!%p1139_p5)  ;;  %v633_v37 = vld [vmem:[#allocation4 + $0x18] sm:$0xff] (!%p1139_p5)  ;;  %v634_v38 = vld [vmem:[#allocation4 + $0x20] sm:$0xff] (!%p1139_p5)  ;;  %vm760_vm8 = vcmask (!%p1139_p5), 523264   ;;  %s809_s17 = sld [smem:[#allocation5]] (!%p1139_p5) }
 0x123   : > { %v1553_v17 = vshrl.u32 (!%p1139_p5), %v593_v16, 7  ;;  %v635_v40 = vld [vmem:[#allocation4 + $0x28] sm:$0xff] (!%p1139_p5)  ;;  %v636_v41 = vld [vmem:[#allocation4 + $0x30] sm:$0xff] (!%p1139_p5)  ;;  %v637_v42 = vld [vmem:[#allocation4 + $0x38] sm:$0xff] (!%p1139_p5) }
 0x124   : > { %v583_v8 = vld [vmem:[#allocation2] sm:$0x1] (!%p1139_p5)  ;;  %v602_v21 = vunpack.c.0.s8 (!%p1139_p5), %v601_v19  ;;  %v638_v43 = vld [vmem:[#allocation4 + $0x40] sm:$0xff] (!%p1139_p5)  ;;  %v639_v36 = vld [vmem:[#allocation4 + $0x48] sm:$0xff] (!%p1139_p5) }
 0x125   : > { %v584_v10 = vmul.f32 (!%p1139_p5), 0.125, %v583_v8  ;;  %v595_v20 = vsub.s32 (!%p1139_p5), 0, %v1553_v17  ;;  %v742_v39 = vsub.s32 (!%p1139_p5), 3, %v1553_v17  ;;  %v640_v49 = vld [vmem:[#allocation4 + $0x50] sm:$0xff] (!%p1139_p5)  ;;  %v641_v50 = vld [vmem:[#allocation4 + $0x58] sm:$0xff] (!%p1139_p5)  ;;  %v642_v51 = vld [vmem:[#allocation4 + $0x60] sm:$0xff] (!%p1139_p5) }
 0x126   : > { %v585_v9 = vld [vmem:[#allocation3] sm:$0x1] (!%p1139_p5)  ;;  %v605_v24 = vsub.s32 (!%p1139_p5), %v602_v21, %v1553_v17 }
 0x127   : > { %v586_v11 = vmul.f32 (!%p1139_p5), 0.125, %v585_v9  ;;  %v587_v12 = vmul.f32 (!%p1139_p5), %v584_v10, %v584_v10  ;;  %v1571_v56 = vrot.slane (!%p1139_p5), %v1399_v0, %v742_v39 }
 0x129   : > { %v588_v13 = vsub.f32 %v586_v11, %v587_v12 }
 0x12b   : > { %v589_v14 = vmax.f32 %v588_v13, 0.0  ;;  %v643_v13 = vld [vmem:[#allocation4 + $0x68] sm:$0xff] }
 0x12d   : > { %v590_v15 = vadd.f32 1e-05, %v589_v14 }
 0x12f   : > { %1255 = vrsqrt.f32 %v590_v15 }
 0x139   : > { %v1256_v22 = vpop.eup %1255 }
 0x13a   : > { %v596_v23 = vrot.slane %v1256_v22, %v595_v20 }
 0x13c   : > { %v598_v26 = vmul.f32 %v596_v23, %v1399_v0 }
 0x13e   : > { %v606_v27 = vrot.slane %v598_v26, %v605_v24  ;;  %625 = vst.msk [vmem:[#allocation2 - $0x1] sm:$0x2] %vm624_vm6, %v598_v26 }
 0x140   : > { %v607_v28 = vcombine.high %v606_v27, %v606_v27 }
 0x142   : > { %v614_v29 = vrot.slane %v607_v28, %v605_v24 }
 0x144   : > { %v616_v30 = vmul.f32 %v614_v29, %v584_v10 }
 0x145   : > { %v1559_v35 = vld [vmem:[#allocation2] ss:$0 sm:$0xff] }
 0x146   : > { %v621_v31 = vrot.slane %v616_v30, %v595_v20  ;;  %v653_v44 = vmul.f32 %v1559_v35, %v630_v33  ;;  %v655_v45 = vmul.f32 %v1559_v35, %v632_v25  ;;  %v654_v46 = vmul.f32 %v1559_v35, %v631_v34 }
 0x147   : > { %v656_v48 = vmul.f32 %v1559_v35, %v633_v37  ;;  %v657_v52 = vmul.f32 %v1559_v35, %v634_v38  ;;  %v658_v53 = vmul.f32 %v1559_v35, %v635_v40  ;;  %v659_v54 = vmul.f32 %v1559_v35, %v636_v41 }
 0x148   : > { %v623_v32 = vsub.f32 %v1399_v0, %v621_v31  ;;  %v660_v55 = vmul.f32 %v1559_v35, %v637_v42  ;;  %v661_v47 = vmul.f32 %v1559_v35, %v638_v43  ;;  %v662_v58 = vmul.f32 %v1559_v35, %v639_v36  ;;  %v644_v31 = vld [vmem:[#allocation4 + $0x70] sm:$0xff]  ;;  %v645_v36 = vld [vmem:[#allocation4 + $0x78] sm:$0xff] }
 0x149   : > { %v663_v59 = vmul.f32 %v1559_v35, %v640_v49  ;;  %v664_v60 = vmul.f32 %v1559_v35, %v641_v50  ;;  %v1580_v62 = vmul.f32 %v1559_v35, %v642_v51  ;;  %v666_v27 = vmul.f32 %v1559_v35, %v643_v13 }
 0x14a   : > { %627 = vst.msk [vmem:[#allocation3 - $0x2] sm:$0x4] %vm626_vm7, %v623_v32  ;;  %v667_v43 = vmul.f32 %v1559_v35, %v644_v31 }
 0x151   : > { %v1574_v57 = vld [vmem:[#allocation3] ss:$0 sm:$0xff] }
 0x152   : > { %v676_v63 = vadd.f32 %v1574_v57, %v653_v44  ;;  %v678_v1 = vadd.f32 %v1574_v57, %v655_v45  ;;  %v677_v0 = vadd.f32 %v1574_v57, %v654_v46  ;;  %v679_v2 = vadd.f32 %v1574_v57, %v656_v48 }
 0x153   : > { %v680_v3 = vadd.f32 %v1574_v57, %v657_v52  ;;  %v681_v4 = vadd.f32 %v1574_v57, %v658_v53  ;;  %v682_v5 = vadd.f32 %v1574_v57, %v659_v54  ;;  %v683_v6 = vadd.f32 %v1574_v57, %v660_v55 }
 0x154   : > { %vm692_vm9 = vcmp.ge.f32.partialorder %v676_v63, 0.0  ;;  %v708_v61 = vmul.f32 0.2, %v676_v63  ;;  %vm694_vm10 = vcmp.ge.f32.partialorder %v678_v1, 0.0  ;;  %v710_v7 = vmul.f32 0.2, %v678_v1 }
 0x155   : > { %vm693_vm11 = vcmp.ge.f32.partialorder %v677_v0, 0.0  ;;  %v709_v8 = vmul.f32 0.2, %v677_v0  ;;  %vm695_vm12 = vcmp.ge.f32.partialorder %v679_v2, 0.0  ;;  %v711_v9 = vmul.f32 0.2, %v679_v2 }
 0x156   : > { %v724_v10 = vsel %vm692_vm9, %v676_v63, %v708_v61  ;;  %v726_v11 = vsel %vm694_vm10, %v678_v1, %v710_v7  ;;  %vm696_vm13 = vcmp.ge.f32.partialorder %v680_v3, 0.0  ;;  %v712_v12 = vmul.f32 0.2, %v680_v3 }
 0x157   : > { %v744_v14 = vmul.f32 %v1571_v56, %v724_v10  ;;  %v746_v15 = vmul.f32 %v1571_v56, %v726_v11  ;;  %v725_v18 = vsel %vm693_vm11, %v677_v0, %v709_v8  ;;  %v727_v19 = vsel %vm695_vm12, %v679_v2, %v711_v9 }
 0x158   : > { %v745_v20 = vmul.f32 %v1571_v56, %v725_v18  ;;  %v747_v21 = vmul.f32 %v1571_v56, %v727_v19  ;;  %v728_v22 = vsel %vm696_vm13, %v680_v3, %v712_v12  ;;  %vm697_vm14 = vcmp.ge.f32.partialorder %v681_v4, 0.0 }
 0x159   : > { %v761_v23 = vsel %vm760_vm8, %v744_v14, 0.0  ;;  %v767_v24 = vsel %vm760_vm8, %v746_v15, 0.0  ;;  %v713_v26 = vmul.f32 0.2, %v681_v4  ;;  %v748_v29 = vmul.f32 %v1571_v56, %v728_v22 }
 0x15a   : > { %762 = vadd.xlane.f32.xlu0 %v761_v23  ;;  %768 = vadd.xlane.f32.xlu1 %v767_v24  ;;  %v764_v28 = vsel %vm760_vm8, %v745_v20, 0.0  ;;  %vm698_vm15 = vcmp.ge.f32.partialorder %v682_v5, 0.0  ;;  %v714_v30 = vmul.f32 0.2, %v682_v5  ;;  %v770_v32 = vsel %vm760_vm8, %v747_v21, 0.0 }
 0x15b   : > { %v729_v33 = vsel %vm697_vm14, %v681_v4, %v713_v26  ;;  %vm699_vm0 = vcmp.ge.f32.partialorder %v683_v6, 0.0  ;;  %v715_v25 = vmul.f32 0.2, %v683_v6  ;;  %v684_v38 = vadd.f32 %v1574_v57, %v661_v47 }
 0x15c   : > { %v749_v34 = vmul.f32 %v1571_v56, %v729_v33  ;;  %v730_v37 = vsel %vm698_vm15, %v682_v5, %v714_v30  ;;  %v685_v39 = vadd.f32 %v1574_v57, %v662_v58  ;;  %v686_v41 = vadd.f32 %v1574_v57, %v663_v59 }
 0x15d   : > { %v731_v40 = vsel %vm699_vm0, %v683_v6, %v715_v25  ;;  %v687_v42 = vadd.f32 %v1574_v57, %v664_v60  ;;  %v773_v44 = vsel %vm760_vm8, %v748_v29, 0.0  ;;  %v750_v45 = vmul.f32 %v1571_v56, %v730_v37 }
 0x15e   : > { %765 = vadd.xlane.f32.xlu0 %v764_v28  ;;  %771 = vadd.xlane.f32.xlu1 %v770_v32  ;;  %vm700_vm1 = vcmp.ge.f32.partialorder %v684_v38, 0.0  ;;  %v716_v46 = vmul.f32 0.2, %v684_v38  ;;  %v776_v48 = vsel %vm760_vm8, %v749_v34, 0.0  ;;  %v751_v49 = vmul.f32 %v1571_v56, %v731_v40 }
 0x15f   : > { %vm701_vm2 = vcmp.ge.f32.partialorder %v685_v39, 0.0  ;;  %v717_v50 = vmul.f32 0.2, %v685_v39  ;;  %vm702_vm3 = vcmp.ge.f32.partialorder %v686_v41, 0.0  ;;  %v718_v52 = vmul.f32 0.2, %v686_v41 }
 0x160   : > { %v732_v51 = vsel %vm700_vm1, %v684_v38, %v716_v46  ;;  %v668_v53 = vmul.f32 %v1559_v35, %v645_v36  ;;  %vm703_vm4 = vcmp.ge.f32.partialorder %v687_v42, 0.0  ;;  %v719_v55 = vmul.f32 0.2, %v687_v42 }
 0x161   : > { %v733_v54 = vsel %vm701_vm2, %v685_v39, %v717_v50  ;;  %v688_v47 = vadd.f32 %v1574_v57, %v1580_v62  ;;  %v689_v58 = vadd.f32 %v1574_v57, %v666_v27  ;;  %v779_v59 = vsel %vm760_vm8, %v750_v45, 0.0 }
 0x162   : > { %774 = vadd.xlane.f32.xlu0 %v773_v44  ;;  %777 = vadd.xlane.f32.xlu1 %v776_v48  ;;  %v782_v60 = vsel %vm760_vm8, %v751_v49, 0.0  ;;  %v752_v63 = vmul.f32 %v1571_v56, %v732_v51  ;;  %v753_v1 = vmul.f32 %v1571_v56, %v733_v54  ;;  %v734_v0 = vsel %vm702_vm3, %v686_v41, %v718_v52 }
 0x163   : > { %v735_v35 = vsel %vm703_vm4, %v687_v42, %v719_v55  ;;  %vm704_vm5 = vcmp.ge.f32.partialorder %v688_v47, 0.0  ;;  %v720_v2 = vmul.f32 0.2, %v688_v47  ;;  %vm705_vm6 = vcmp.ge.f32.partialorder %v689_v58, 0.0 }
 0x164   : > { %v721_v3 = vmul.f32 0.2, %v689_v58  ;;  %v690_v62 = vadd.f32 %v1574_v57, %v667_v43  ;;  %v691_v4 = vadd.f32 %v1574_v57, %v668_v53  ;;  %v785_v5 = vsel %vm760_vm8, %v752_v63, 0.0 }
 0x165   : > { %v788_v6 = vsel %vm760_vm8, %v753_v1, 0.0  ;;  %v754_v61 = vmul.f32 %v1571_v56, %v734_v0  ;;  %v755_v7 = vmul.f32 %v1571_v56, %v735_v35  ;;  %v736_v8 = vsel %vm704_vm5, %v688_v47, %v720_v2 }
 0x166   : > { %780 = vadd.xlane.f32.xlu0 %v779_v59  ;;  %783 = vadd.xlane.f32.xlu1 %v782_v60  ;;  %v737_v9 = vsel %vm705_vm6, %v689_v58, %v721_v3  ;;  %v722_v10 = vmul.f32 0.2, %v690_v62  ;;  %v723_v11 = vmul.f32 0.2, %v691_v4  ;;  %vm706_vm7 = vcmp.ge.f32.partialorder %v690_v62, 0.0 }
 0x167   : > { %vm707_vm9 = vcmp.ge.f32.partialorder %v691_v4, 0.0  ;;  %v791_v57 = vsel %vm760_vm8, %v754_v61, 0.0  ;;  %v794_v12 = vsel %vm760_vm8, %v755_v7, 0.0  ;;  %v756_v13 = vmul.f32 %v1571_v56, %v736_v8 }
 0x168   : > { %v757_v14 = vmul.f32 %v1571_v56, %v737_v9  ;;  %v738_v15 = vsel %vm706_vm7, %v690_v62, %v722_v10  ;;  %v739_v18 = vsel %vm707_vm9, %v691_v4, %v723_v11  ;;  %v1634_v26 = vstv %s809_s17 }
 0x169   : > { %v797_v19 = vsel %vm760_vm8, %v756_v13, 0.0  ;;  %v758_v21 = vmul.f32 %v1571_v56, %v738_v15  ;;  %v759_v22 = vmul.f32 %v1571_v56, %v739_v18  ;;  %v1647_v63 = vand.u32 127, %v593_v16 }
 0x16a   : > { %786 = vadd.xlane.f32.xlu0 %v785_v5  ;;  %789 = vadd.xlane.f32.xlu1 %v788_v6  ;;  %v800_v20 = vsel %vm760_vm8, %v757_v14, 0.0  ;;  %vm957_vm10 = vcmask 195712   ;;  %vm964_vm11 = vcmask 261312   ;;  %vm971_vm12 = vcmask 326912  }
 0x16b   : > { %v803_v23 = vsel %vm760_vm8, %v758_v21, 0.0  ;;  %v806_v24 = vsel %vm760_vm8, %v759_v22, 0.0  ;;  %v952_v7 = vadd.s32 4294967280, %v1647_v63  ;;  %v945_v9 = vadd.s32 4294967288, %v1647_v63 }
 0x16c   : > { %v959_v18 = vadd.s32 4294967272, %v1647_v63  ;;  %vm950_vm8 = vcmask 130112   ;;  %vm978_vm13 = vcmask 392512   ;;  %vm985_vm14 = vcmask 458112  }
 0x16d   : > { %vm992_vm15 = vcmask 523712   ;;  %vm999_vm0 = vcmask 589312   ;;  %vm1006_vm1 = vcmask 654912   ;;  %vm1013_vm2 = vcmask 720512  }
 0x16e   : > { %792 = vadd.xlane.f32.xlu0 %v791_v57  ;;  %795 = vadd.xlane.f32.xlu1 %v794_v12  ;;  %vm1020_vm3 = vcmask 786112   ;;  %vm1027_vm4 = vcmask 851712   ;;  %vm1034_vm5 = vcmask 917312   ;;  %vm1041_vm6 = vcmask 982912  }
 0x16f   : > { %vm1048_vm7 = vcmask 1048512  }
 0x172   : > { %798 = vadd.xlane.f32.xlu0 %v797_v19  ;;  %801 = vadd.xlane.f32.xlu1 %v800_v20  ;;  %v943_v20 = vsub.s32 %v1647_v63, %v1553_v17 }
 0x176   : > { %804 = vadd.xlane.f32.xlu0 %v803_v23  ;;  %807 = vadd.xlane.f32.xlu1 %v806_v24  ;;  %v955_v24 = vsub.s32 %v952_v7, %v1553_v17 }
 0x1e7   : > { %v763_v27 = vpop.xlane.xlu0 %762  ;;  %v769_v28 = vpop.xlane.xlu1 %768 }
 0x1e8   : > { %v811_v29 = vadd.f32 %v1634_v26, %v763_v27  ;;  %v813_v30 = vadd.f32 %v1634_v26, %v769_v28  ;;  %v966_v27 = vadd.s32 4294967264, %v1647_v63 }
 0x1ea   : > { %v1142_v31 = vmul.f32 -1.442695, %v811_v29  ;;  %v1144_v32 = vmul.f32 -1.442695, %v813_v30 }
 0x1eb   : > { %v766_v56 = vpop.xlane.xlu0 %765  ;;  %v772_v33 = vpop.xlane.xlu1 %771 }
 0x1ec   : > { %1257 = vpow2.f32 %v1142_v31  ;;  %v812_v25 = vadd.f32 %v1634_v26, %v766_v56  ;;  %v814_v34 = vadd.f32 %v1634_v26, %v772_v33 }
 0x1ed   : > { %1259 = vpow2.f32 %v1144_v32  ;;  %v948_v32 = vsub.s32 %v945_v9, %v1553_v17 }
 0x1ee   : > { %v1143_v37 = vmul.f32 -1.442695, %v812_v25  ;;  %v1145_v38 = vmul.f32 -1.442695, %v814_v34  ;;  %v962_v34 = vsub.s32 %v959_v18, %v1553_v17 }
 0x1ef   : > { %v775_v39 = vpop.xlane.xlu0 %774  ;;  %v778_v40 = vpop.xlane.xlu1 %777 }
 0x1f0   : > { %1261 = vpow2.f32 %v1143_v37  ;;  %v815_v41 = vadd.f32 %v1634_v26, %v775_v39  ;;  %v816_v42 = vadd.f32 %v1634_v26, %v778_v40  ;;  %v973_v37 = vadd.s32 4294967256, %v1647_v63 }
 0x1f1   : > { %1263 = vpow2.f32 %v1145_v38 }
 0x1f2   : > { %v1146_v43 = vmul.f32 -1.442695, %v815_v41  ;;  %v1147_v36 = vmul.f32 -1.442695, %v816_v42  ;;  %v969_v42 = vsub.s32 %v966_v27, %v1553_v17  ;;  %v1022_v27 = vadd.s32 4294967200, %v1647_v63 }
 0x1f3   : > { %v781_v44 = vpop.xlane.xlu0 %780  ;;  %v784_v45 = vpop.xlane.xlu1 %783 }
 0x1f4   : > { %1265 = vpow2.f32 %v1146_v43  ;;  %v817_v46 = vadd.f32 %v1634_v26, %v781_v44  ;;  %v818_v48 = vadd.f32 %v1634_v26, %v784_v45 }
 0x1f5   : > { %1267 = vpow2.f32 %v1147_v36 }
 0x1f6   : > { %v1258_v49 = vpop.eup %1257  ;;  %v1148_v50 = vmul.f32 -1.442695, %v817_v46  ;;  %v1149_v53 = vmul.f32 -1.442695, %v818_v48  ;;  %v980_v46 = vadd.s32 4294967248, %v1647_v63 }
 0x1f7   : > { %v1260_v51 = vpop.eup %1259  ;;  %v875_v52 = vadd.f32 1.0, %v1258_v49  ;;  %v787_v54 = vpop.xlane.xlu0 %786 }
 0x1f8   : > { %v790_v55 = vpop.xlane.xlu1 %789  ;;  %v877_v47 = vadd.f32 1.0, %v1260_v51  ;;  %1269 = vpow2.f32 %v1148_v50  ;;  %v819_v58 = vadd.f32 %v1634_v26, %v787_v54  ;;  %v976_v51 = vsub.s32 %v973_v37, %v1553_v17 }
 0x1f9   : > { %v820_v59 = vadd.f32 %v1634_v26, %v790_v55  ;;  %1271 = vrcp.f32 %v875_v52  ;;  %v987_v54 = vadd.s32 4294967240, %v1647_v63 }
 0x1fa   : > { %v1262_v60 = vpop.eup %1261  ;;  %1273 = vrcp.f32 %v877_v47  ;;  %v1150_v1 = vmul.f32 -1.442695, %v819_v58 }
 0x1fb   : > { %v1264_v0 = vpop.eup %1263  ;;  %v876_v35 = vadd.f32 1.0, %v1262_v60  ;;  %1275 = vpow2.f32 %v1149_v53  ;;  %v1151_v2 = vmul.f32 -1.442695, %v820_v59  ;;  %v793_v3 = vpop.xlane.xlu0 %792  ;;  %v994_v59 = vadd.s32 4294967232, %v1647_v63 }
 0x1fc   : > { %v796_v62 = vpop.xlane.xlu1 %795  ;;  %v878_v4 = vadd.f32 1.0, %v1264_v0  ;;  %1277 = vpow2.f32 %v1150_v1  ;;  %v821_v5 = vadd.f32 %v1634_v26, %v793_v3 }
 0x1fd   : > { %v822_v6 = vadd.f32 %v1634_v26, %v796_v62  ;;  %1279 = vrcp.f32 %v876_v35  ;;  %v983_v35 = vsub.s32 %v980_v46, %v1553_v17  ;;  %v997_v7 = vsub.s32 %v994_v59, %v1553_v17 }
 0x1fe   : > { %v1266_v61 = vpop.eup %1265  ;;  %1281 = vrcp.f32 %v878_v4  ;;  %v1152_v16 = vmul.f32 -1.442695, %v821_v5  ;;  %v990_v4 = vsub.s32 %v987_v54, %v1553_v17 }
 0x1ff   : > { %v1268_v8 = vpop.eup %1267  ;;  %v879_v10 = vadd.f32 1.0, %v1266_v61  ;;  %1283 = vpow2.f32 %v1151_v2  ;;  %v1153_v11 = vmul.f32 -1.442695, %v822_v6  ;;  %v799_v57 = vpop.xlane.xlu0 %798 }
 0x200   : > { %v802_v12 = vpop.xlane.xlu1 %801  ;;  %v880_v13 = vadd.f32 1.0, %v1268_v8  ;;  %1285 = vpow2.f32 %v1152_v16  ;;  %v823_v14 = vadd.f32 %v1634_v26, %v799_v57  ;;  %v1001_v16 = vadd.s32 4294967224, %v1647_v63 }
 0x201   : > { %v824_v15 = vadd.f32 %v1634_v26, %v802_v12  ;;  %1287 = vrcp.f32 %v879_v10  ;;  %v1008_v57 = vadd.s32 4294967216, %v1647_v63 }
 0x202   : > { %v1270_v19 = vpop.eup %1269  ;;  %1289 = vrcp.f32 %v880_v13  ;;  %v1154_v21 = vmul.f32 -1.442695, %v823_v14  ;;  %v1015_v14 = vadd.s32 4294967208, %v1647_v63 }
 0x203   : > { %v1155_v22 = vmul.f32 -1.442695, %v824_v15  ;;  %v1272_v23 = vpop.eup %1271  ;;  %v881_v28 = vadd.f32 1.0, %v1270_v19  ;;  %1291 = vpow2.f32 %v1153_v11  ;;  %v805_v29 = vpop.xlane.xlu0 %804 }
 0x204   : > { %v808_v30 = vpop.xlane.xlu1 %807  ;;  %v1274_v31 = vpop.eup %1273  ;;  %1293 = vpow2.f32 %v1154_v21  ;;  %v825_v56 = vadd.f32 %v1634_v26, %v805_v29 }
 0x205   : > { %v826_v33 = vadd.f32 %v1634_v26, %v808_v30  ;;  %v1276_v25 = vpop.eup %1275  ;;  %1295 = vrcp.f32 %v881_v28  ;;  %v944_v26 = vrot.slane %v1272_v23, %v943_v20  ;;  %v956_v49 = vrot.slane %v1274_v31, %v955_v24 }
 0x206   : > { %v1278_v38 = vpop.eup %1277  ;;  %v882_v39 = vadd.f32 1.0, %v1276_v25  ;;  %1297 = vpow2.f32 %v1155_v22  ;;  %v1156_v40 = vmul.f32 -1.442695, %v825_v56  ;;  %v1004_v20 = vsub.s32 %v1001_v16, %v1553_v17 }
 0x207   : > { %v1280_v41 = vpop.eup %1279  ;;  %v883_v43 = vadd.f32 1.0, %v1278_v38  ;;  %v1157_v36 = vmul.f32 -1.442695, %v826_v33  ;;  %v1011_v24 = vsub.s32 %v1008_v57, %v1553_v17  ;;  %v1018_v31 = vsub.s32 %v1015_v14, %v1553_v17 }
 0x208   : > { %v1282_v44 = vpop.eup %1281  ;;  %v949_v45 = vrot.slane %v1280_v41, %v948_v32  ;;  %1299 = vrcp.f32 %v882_v39  ;;  %v1025_v39 = vsub.s32 %v1022_v27, %v1553_v17  ;;  %v1036_v41 = vadd.s32 4294967184, %v1647_v63 }
 0x209   : > { %v1284_v48 = vpop.eup %1283  ;;  %v963_v50 = vrot.slane %v1282_v44, %v962_v34  ;;  %1301 = vrcp.f32 %v883_v43  ;;  %v1029_v34 = vadd.s32 4294967192, %v1647_v63 }
 0x20a   : > { %v1286_v52 = vpop.eup %1285  ;;  %v951_v53 = vsel %vm950_vm8, %v949_v45, %v944_v26  ;;  %v884_v55 = vadd.f32 1.0, %v1284_v48  ;;  %1303 = vpow2.f32 %v1156_v40  ;;  %v1043_v26 = vadd.s32 4294967176, %v1647_v63 }
 0x20b   : > { %v1288_v47 = vpop.eup %1287  ;;  %v958_v58 = vsel %vm957_vm10, %v956_v49, %v951_v53  ;;  %v885_v60 = vadd.f32 1.0, %v1286_v52  ;;  %1305 = vpow2.f32 %v1157_v36  ;;  %v1032_v44 = vsub.s32 %v1029_v34, %v1553_v17 }
 0x20c   : > { %v1290_v1 = vpop.eup %1289  ;;  %v970_v0 = vrot.slane %v1288_v47, %v969_v42  ;;  %1307 = vrcp.f32 %v884_v55  ;;  %v965_v3 = vsel %vm964_vm11, %v963_v50, %v958_v58  ;;  %v1039_v49 = vsub.s32 %v1036_v41, %v1553_v17 }
 0x20d   : > { %v1292_v2 = vpop.eup %1291  ;;  %1309 = vrcp.f32 %v885_v60  ;;  %v977_v61 = vrot.slane %v1290_v1, %v976_v51  ;;  %v1046_v52 = vsub.s32 %v1043_v26, %v1553_v17 }
 0x20e   : > { %v1294_v62 = vpop.eup %1293  ;;  %v886_v5 = vadd.f32 1.0, %v1292_v2  ;;  %v972_v10 = vsel %vm971_vm12, %v970_v0, %v965_v3 }
 0x20f   : > { %v1296_v6 = vpop.eup %1295  ;;  %v887_v8 = vadd.f32 1.0, %v1294_v62  ;;  %v979_v18 = vsel %vm978_vm13, %v977_v61, %v972_v10 }
 0x210   : > { %v1298_v9 = vpop.eup %1297  ;;  %v984_v11 = vrot.slane %v1296_v6, %v983_v35  ;;  %1311 = vrcp.f32 %v886_v5 }
 0x211   : > { %1313 = vrcp.f32 %v887_v8  ;;  %v888_v12 = vadd.f32 1.0, %v1298_v9 }
 0x212   : > { %v1300_v13 = vpop.eup %1299  ;;  %v986_v22 = vsel %vm985_vm14, %v984_v11, %v979_v18 }
 0x213   : > { %v1302_v15 = vpop.eup %1301  ;;  %v991_v19 = vrot.slane %v1300_v13, %v990_v4  ;;  %1315 = vrcp.f32 %v888_v12 }
 0x214   : > { %v1304_v21 = vpop.eup %1303  ;;  %v998_v23 = vrot.slane %v1302_v15, %v997_v7 }
 0x215   : > { %v1306_v28 = vpop.eup %1305  ;;  %v889_v29 = vadd.f32 1.0, %v1304_v21  ;;  %v993_v33 = vsel %vm992_vm15, %v991_v19, %v986_v22 }
 0x216   : > { %v1308_v30 = vpop.eup %1307  ;;  %v890_v32 = vadd.f32 1.0, %v1306_v28  ;;  %v1000_v37 = vsel %vm999_vm0, %v998_v23, %v993_v33 }
 0x217   : > { %v1310_v56 = vpop.eup %1309  ;;  %v1005_v25 = vrot.slane %v1308_v30, %v1004_v20  ;;  %1317 = vrcp.f32 %v889_v29 }
 0x218   : > { %v1012_v38 = vrot.slane %v1310_v56, %v1011_v24  ;;  %1319 = vrcp.f32 %v890_v32 }
 0x219   : > { %v1007_v43 = vsel %vm1006_vm1, %v1005_v25, %v1000_v37 }
 0x21a   : > { %v1312_v40 = vpop.eup %1311  ;;  %v1014_v45 = vsel %vm1013_vm2, %v1012_v38, %v1007_v43 }
 0x21b   : > { %v1314_v42 = vpop.eup %1313  ;;  %v1019_v36 = vrot.slane %v1312_v40, %v1018_v31 }
 0x21c   : > { %v1026_v46 = vrot.slane %v1314_v42, %v1025_v39 }
 0x21d   : > { %v1316_v48 = vpop.eup %1315  ;;  %v1021_v50 = vsel %vm1020_vm3, %v1019_v36, %v1014_v45 }
 0x21e   : > { %v1033_v51 = vrot.slane %v1316_v48, %v1032_v44  ;;  %v1028_v53 = vsel %vm1027_vm4, %v1026_v46, %v1021_v50 }
 0x220   : > { %v1035_v58 = vsel %vm1034_vm5, %v1033_v51, %v1028_v53 }
 0x221   : > { %v1318_v54 = vpop.eup %1317 }
 0x222   : > { %v1320_v55 = vpop.eup %1319  ;;  %v1040_v47 = vrot.slane %v1318_v54, %v1039_v49 }
 0x223   : > { %v1047_v63 = vrot.slane %v1320_v55, %v1046_v52 }
 0x224   : > { %v1042_v59 = vsel %vm1041_vm6, %v1040_v47, %v1035_v58 }
 0x225   : > { %v1049_v60 = vsel %vm1048_vm7, %v1047_v63, %v1042_v59 }
 0x226   : > { %1051 = vst [vmem:[%s1709_s4] sm:$0x1] %v1049_v60 }
 0x227 PF: > { %s15_s19 = sadd.s32 1, %s1343_s19   ;;  %s1710_s17 = smov %s1339_s18 }
 0x228   : > { %p12_p6 = scmp.ge.s32.totalorder %s15_s19, 4   ;;  %s1711_s18 = smov %s1713_s3 }
 0x22a   :  { %14 = sbr.rel (!%p12_p6) target bundleno = 2 (0x2), region = 84 }

</bundles_post_ra>
